<compile_context>
chip_gen: v7x
topology: tpu7x:2x2x1
jax: 0.10.0
libtpu: 0.0.40
codegen_flags: <defaults>
</compile_context>

<pallas_src>
import math

import jax
import jax.numpy as jnp
from jax.experimental import pallas as pl
from jax.experimental.pallas import tpu as pltpu


def _round_up(x, m):
    return ((x + m - 1) // m) * m


def _choose_tile_rows(v_rows, row_bytes, target_bytes):
    """Grouped rows per grid step: ~target_bytes of features per step,
    sublane-aligned, and >= 2 grid steps when possible (v7x megacore)."""
    if v_rows <= 8:
        return v_rows                               # one full-extent block
    t = max(8, target_bytes // max(row_bytes, 1))   # ~4 MiB of features/step
    t = min(t, _round_up(-(-v_rows // 2), 8))       # >= 2 grid steps
    t = max(8, (t // 8) * 8)                        # multiple of 8 (sublanes)
    return min(t, v_rows)


def _mean_vfe_kernel(feat_ref, inv_ref, sum_mat_ref, out_ref):
    # feat_ref:    (tile_rows, G*P*C)  input dtype   grouped point features
    # inv_ref:     (tile_rows, G*C)    f32           1/clamp(count,1), repeated C times
    # sum_mat_ref: (G*P*C,    G*C)     input dtype   block-diagonal 0/1 summing matrix
    # out_ref:     (tile_rows, G*C)    output dtype
    points_sum = jnp.dot(
        feat_ref[...], sum_mat_ref[...],
        preferred_element_type=jnp.float32,          # f32 accumulation on MXU
    )                                                # (tile_rows, G*C) f32
    out_ref[...] = (points_sum * inv_ref[...]).astype(out_ref.dtype)


def mean_vfe(features, num_voxels, coors=None, *,
             target_block_bytes=4 << 20, sum_mat_budget_bytes=4 << 20):
    """Pallas implementation of MeanVFE.forward.

    features:   (V, P, C) float array (padded point slots assumed zeroed)
    num_voxels: (V,) int/float array of valid-point counts per voxel
    coors:      unused (kept for API parity with the PyTorch module)
    """
    del coors  # unused, as in the PyTorch module
    V, P, C = features.shape
    dtype = features.dtype
    if V == 0:
        return jnp.zeros((0, C), dtype)
    itemsize = jnp.dtype(dtype).itemsize

    # Voxels per packed row: smallest G with (G*C) % 128 == 0, capped so the
    # block-diagonal summing matrix stays small (VMEM budget, v7x-safe).
    G = 128 // math.gcd(C, 128)
    while G > 1 and (G * P * C) * (G * C) * itemsize > sum_mat_budget_bytes:
        G //= 2

    v_main = (V // G) * G            # voxels handled by the Pallas kernel
    out_main = None
    if v_main > 0:
        v_rows = v_main // G
        # Free bitcast when v_main == V (pick max_voxels as a multiple of
        # 128 // gcd(C, 128) to guarantee this); otherwise a prefix slice.
        feat_main = features[:v_main].reshape(v_rows, G * P * C)

        # 1 / clamp_min(count, 1), repeated C times along lanes -> (v_rows, G*C).
        inv = 1.0 / jnp.maximum(num_voxels[:v_main].astype(jnp.float32), 1.0)
        inv_main = jnp.broadcast_to(inv[:, None], (v_main, C)).reshape(v_rows, G * C)

        # Block-diagonal 0/1 summing matrix:
        #   out[r, g*C + c] = sum_p feat[r, g*P*C + p*C + c]
        sum_mat = jnp.kron(jnp.eye(G, dtype=dtype),
                           jnp.tile(jnp.eye(C, dtype=dtype), (P, 1)))

        row_bytes = G * P * C * itemsize
        tile_rows = _choose_tile_rows(v_rows, row_bytes, target_block_bytes)
        grid = (pl.cdiv(v_rows, tile_rows),)

        cost = pl.CostEstimate(
            flops=2 * v_rows * (G * P * C) * (G * C),
            transcendentals=0,
            bytes_accessed=(v_main * P * C * itemsize           # features (read once)
                            + v_main * C * (4 + itemsize)       # inv read + out write
                            + G * P * C * G * C * itemsize))    # summing matrix

        out_main = pl.pallas_call(
            _mean_vfe_kernel,
            out_shape=jax.ShapeDtypeStruct((v_rows, G * C), dtype),
            grid=grid,
            in_specs=[
                pl.BlockSpec((tile_rows, G * P * C), lambda i: (i, 0)),
                pl.BlockSpec((tile_rows, G * C), lambda i: (i, 0)),
                pl.BlockSpec((G * P * C, G * C), lambda i: (0, 0)),  # resident constant
            ],
            out_specs=pl.BlockSpec((tile_rows, G * C), lambda i: (i, 0)),
            compiler_params=pltpu.CompilerParams(
                dimension_semantics=("parallel",),
                vmem_limit_bytes=32 * 1024 * 1024,
            ),
            cost_estimate=cost,
        )(feat_main, inv_main, sum_mat)
        out_main = out_main.reshape(v_main, C)

    if v_main == V:
        return out_main

    # < G voxel tail: trivial plain-JAX epilogue (avoids padding the big array).
    tail_feat = features[v_main:]
    tail_norm = jnp.maximum(
        num_voxels[v_main:].astype(jnp.float32), 1.0).astype(dtype)[:, None]
    out_tail = (tail_feat.sum(axis=1) / tail_norm).astype(dtype)
    if out_main is None:
        return out_tail
    return jnp.concatenate([out_main, out_tail], axis=0)


if __name__ == "__main__":
    base_key = jax.random.PRNGKey(0)

    P, C = 8, 4                      # max points / voxel, num_point_features
    fwd = jax.jit(mean_vfe)

    # Case 1 (V=512): V multiple of the lane group G=32 -> pure kernel path,
    #                 2 grid steps.
    # Case 2 (V=300): partial last kernel block + 12-voxel plain-JAX tail.
    for V in (512, 300):
        k_feat, k_cnt = jax.random.split(jax.random.fold_in(base_key, V))
        features = jax.random.normal(k_feat, (V, P, C), dtype=jnp.float32)
        num_voxels = jax.random.randint(k_cnt, (V,), 0, P + 1, dtype=jnp.int32)
        coors = jnp.zeros((V, 4), dtype=jnp.int32)   # unused, API parity

        # Zero padded (invalid) point slots, matching the voxelizer contract.
        valid = jnp.arange(P)[None, :, None] < num_voxels[:, None, None]
        features = jnp.where(valid, features, 0.0)

        out = jax.block_until_ready(fwd(features, num_voxels, coors))

        # Reference in plain JAX (PyTorch semantics).
        ref = features.sum(axis=1) / jnp.maximum(
            num_voxels[:, None].astype(jnp.float32), 1.0)
        assert out.shape == (V, C)
        assert jnp.allclose(out, ref, atol=1e-5, rtol=1e-5), (
            "max abs err = %g" % float(jnp.max(jnp.abs(out - ref))))

    print("KERNEL_OK")
</pallas_src>

<mosaic_0001>
module attributes {stable_mosaic.version = 11 : i64} {
  func.func @_mean_vfe_kernel(%arg0: i32, %arg1: memref<8x1024xf32, #tpu.memory_space<vmem>>, %arg2: memref<8x128xf32, #tpu.memory_space<vmem>>, %arg3: memref<1024x128xf32, #tpu.memory_space<vmem>>, %arg4: memref<8x128xf32, #tpu.memory_space<vmem>>) attributes {dimension_semantics = [#tpu.dimension_semantics<parallel>], iteration_bounds = array<i64: 2>, scalar_prefetch = 0 : i64, scratch_operands = 0 : i64, tpu.core_type = #tpu.core_type<tc>, window_params = [{transform_indices = @transform_0, window_bounds = array<i64: 8, 1024>}, {transform_indices = @transform_1, window_bounds = array<i64: 8, 128>}, {pipeline_mode = #tpu.pipeline_mode<synchronous>, transform_indices = @transform_2, window_bounds = array<i64: 1024, 128>}, {transform_indices = @transform_3, window_bounds = array<i64: 8, 128>}]} {
    %c0 = arith.constant 0 : index
    %c0_0 = arith.constant 0 : index
    %0 = vector.load %arg1[%c0, %c0_0] : memref<8x1024xf32, #tpu.memory_space<vmem>>, vector<8x1024xf32>
    %c0_1 = arith.constant 0 : index
    %c0_2 = arith.constant 0 : index
    %1 = vector.load %arg3[%c0_1, %c0_2] : memref<1024x128xf32, #tpu.memory_space<vmem>>, vector<1024x128xf32>
    %cst = arith.constant dense<0.000000e+00> : vector<8x128xf32>
    %2 = tpu.matmul %0, %1, %cst {dimension_numbers = #tpu.dot_dimension_numbers<[1], [0], [0], [1], [0, 0, 1, 1], [], []>} : vector<8x1024xf32>, vector<1024x128xf32>, vector<8x128xf32> -> vector<8x128xf32>
    %c0_3 = arith.constant 0 : index
    %c0_4 = arith.constant 0 : index
    %3 = vector.load %arg2[%c0_3, %c0_4] : memref<8x128xf32, #tpu.memory_space<vmem>>, vector<8x128xf32>
    %4 = arith.mulf %2, %3 : vector<8x128xf32>
    %c0_5 = arith.constant 0 : index
    %c0_6 = arith.constant 0 : index
    %5 = vector.load %arg4[%c0_5, %c0_6] : memref<8x128xf32, #tpu.memory_space<vmem>>, vector<8x128xf32>
    tpu.vector_store %arg4[%c0_5, %c0_6], %4 {strides = array<i32>} : memref<8x128xf32, #tpu.memory_space<vmem>>, vector<8x128xf32>,
    return
  }
  func.func @transform_0(%arg0: i32) -> (i32, i32) {
    %c0_i32 = arith.constant 0 : i32
    %c0_i32_0 = arith.constant 0 : i32
    return %arg0, %c0_i32 : i32, i32
  }
  func.func @transform_1(%arg0: i32) -> (i32, i32) {
    %c0_i32 = arith.constant 0 : i32
    %c0_i32_0 = arith.constant 0 : i32
    return %arg0, %c0_i32 : i32, i32
  }
  func.func @transform_2(%arg0: i32) -> (i32, i32) {
    %c0_i32 = arith.constant 0 : i32
    %c0_i32_0 = arith.constant 0 : i32
    %c0_i32_1 = arith.constant 0 : i32
    return %c0_i32, %c0_i32_0 : i32, i32
  }
  func.func @transform_3(%arg0: i32) -> (i32, i32) {
    %c0_i32 = arith.constant 0 : i32
    %c0_i32_0 = arith.constant 0 : i32
    return %arg0, %c0_i32 : i32, i32
  }
}

</mosaic_0001>

<bundles_post_ra>
// kernel: mean_vfe.1
= control target key start
LH: loop header
LB: loop body
LE: loop exit
PB: predicated region body
PF: predicated region fallthrough
CT: control target
= control target key end

     0   :  { %s986_s12 = smov 0   ;;  %s1414_s0 = inlined_call_operand.vmem [shape: f32[16,1024], index: 0, kind: input, shape index: {}]   ;;  %s1415_s1 = inlined_call_operand.vmem [shape: f32[16,128], index: 1, kind: input, shape index: {}]   ;;  %s1416_s2 = inlined_call_operand.vmem [shape: f32[1024,128], index: 2, kind: input, shape index: {}]   ;;  %s1417_s3 = inlined_call_operand.vmem [shape: f32[16,128], index: 3, kind: output, shape index: {}]  }
   0x1 LB: > { %s670_s13 = sadd.s32 4294967295, %s964_s12   ;;  %p674_p0 = scmp.ge.s32.totalorder %s964_s12, 1  ;;  %s964_s12 = sphi %s986_s12, %s13_s12  }
   0x2   : > { %p146_p1 = scmp.lt.s32.totalorder %s964_s12, 3 }
   0x4   : > { %p147_p2 = pnand %p674_p0, %p146_p1 }
   0x5   : > { %v210_v0 = vld [vmem:[%s1416_s2 + $0x80] sm:$0xff] (!%p147_p2)  ;;  %v211_v1 = vld [vmem:[%s1416_s2 + $0x88] sm:$0xff] (!%p147_p2)  ;;  %v212_v11 = vld [vmem:[%s1416_s2 + $0x90] sm:$0xff] (!%p147_p2)  ;;  %p1068_p3 = scmp.lt.s32.totalorder (!%p147_p2), %s670_s13, 1 }
   0x6   : > { %150 = sbr.rel (%p147_p2) target bundleno = 295 (0x127), region = 32  ;;  %v242_v2 = vld [vmem:[%s1416_s2 + $0x180] sm:$0xff] (!%p147_p2)  ;;  %v822_v3 = vpack.c.bf16 (!%p147_p2), %v211_v1, %v210_v0  ;;  %v243_v4 = vld [vmem:[%s1416_s2 + $0x188] sm:$0xff] (!%p147_p2)  ;;  %v213_v13 = vld [vmem:[%s1416_s2 + $0x98] sm:$0xff] (!%p147_p2) }
   0x7   : > { %v194_v5 = vld [vmem:[%s1416_s2] sm:$0xff] (!%p147_p2)  ;;  %v195_v6 = vld [vmem:[%s1416_s2 + $0x8] sm:$0xff] (!%p147_p2)  ;;  %v854_v7 = vpack.c.bf16 (!%p147_p2), %v243_v4, %v242_v2  ;;  %v244_v14 = vld [vmem:[%s1416_s2 + $0x190] sm:$0xff] (!%p147_p2)  ;;  %v826_v16 = vpack.c.bf16 (!%p147_p2), %v213_v13, %v212_v11 }
   0x8   : > { %v824_v8 = vpack.c.bf16 (!%p147_p2), %v195_v6, %v194_v5  ;;  %v226_v9 = vld [vmem:[%s1416_s2 + $0x100] sm:$0xff] (!%p147_p2)  ;;  %v227_v10 = vld [vmem:[%s1416_s2 + $0x108] sm:$0xff] (!%p147_p2)  ;;  %823 = vmatprep.subr.bf16.mxu0 (!%p147_p2), %v822_v3  ;;  %v245_v15 = vld [vmem:[%s1416_s2 + $0x198] sm:$0xff] (!%p147_p2) }
   0x9   : > { %v856_v12 = vpack.c.bf16 (!%p147_p2), %v227_v10, %v226_v9  ;;  %855 = vmatprep.subr.bf16.mxu1 (!%p147_p2), %v854_v7  ;;  %v858_v17 = vpack.c.bf16 (!%p147_p2), %v245_v15, %v244_v14  ;;  %v196_v18 = vld [vmem:[%s1416_s2 + $0x10] sm:$0xff] (!%p147_p2)  ;;  %v197_v19 = vld [vmem:[%s1416_s2 + $0x18] sm:$0xff] (!%p147_p2)  ;;  %v214_v23 = vld [vmem:[%s1416_s2 + $0xa0] sm:$0xff] (!%p147_p2) }
   0xa   : > { %825 = vmatpush3.bf16.msra.mxu0 (!%p147_p2), %v824_v8  ;;  %v228_v20 = vld [vmem:[%s1416_s2 + $0x110] sm:$0xff] (!%p147_p2)  ;;  %v828_v21 = vpack.c.bf16 (!%p147_p2), %v197_v19, %v196_v18  ;;  %v229_v22 = vld [vmem:[%s1416_s2 + $0x118] sm:$0xff] (!%p147_p2)  ;;  %v215_v24 = vld [vmem:[%s1416_s2 + $0xa8] sm:$0xff] (!%p147_p2) }
   0xb   : > { %857 = vmatpush3.bf16.msra.mxu1 (!%p147_p2), %v856_v12  ;;  %827 = vmatprep.subr.bf16.mxu0 (!%p147_p2), %v826_v16  ;;  %v860_v25 = vpack.c.bf16 (!%p147_p2), %v229_v22, %v228_v20  ;;  %v830_v26 = vpack.c.bf16 (!%p147_p2), %v215_v24, %v214_v23  ;;  %v246_v27 = vld [vmem:[%s1416_s2 + $0x1a0] sm:$0xff] (!%p147_p2)  ;;  %v247_v28 = vld [vmem:[%s1416_s2 + $0x1a8] sm:$0xff] (!%p147_p2)  ;;  %v216_v35 = vld [vmem:[%s1416_s2 + $0xb0] sm:$0xff] (!%p147_p2) }
   0xc   : > { %859 = vmatprep.subr.bf16.mxu1 (!%p147_p2), %v858_v17  ;;  %v198_v29 = vld [vmem:[%s1416_s2 + $0x20] sm:$0xff] (!%p147_p2)  ;;  %v862_v30 = vpack.c.bf16 (!%p147_p2), %v247_v28, %v246_v27  ;;  %v199_v31 = vld [vmem:[%s1416_s2 + $0x28] sm:$0xff] (!%p147_p2)  ;;  %v217_v36 = vld [vmem:[%s1416_s2 + $0xb8] sm:$0xff] (!%p147_p2) }
   0xd   : > { %v230_v32 = vld [vmem:[%s1416_s2 + $0x120] sm:$0xff]  ;;  %v231_v33 = vld [vmem:[%s1416_s2 + $0x128] sm:$0xff]  ;;  %v832_v34 = vpack.c.bf16 %v199_v31, %v198_v29  ;;  %v248_v37 = vld [vmem:[%s1416_s2 + $0x1b0] sm:$0xff]  ;;  %v834_v39 = vpack.c.bf16 %v217_v36, %v216_v35  ;;  %s1420_s13 = smov (!%p1068_p3, %s670_s13), 1 }
   0xe   : > { %829 = vmatpush3.bf16.msra.mxu0 %v828_v21  ;;  %v864_v38 = vpack.c.bf16 %v231_v33, %v230_v32  ;;  %v249_v40 = vld [vmem:[%s1416_s2 + $0x1b8] sm:$0xff]  ;;  %v200_v41 = vld [vmem:[%s1416_s2 + $0x30] sm:$0xff]  ;;  %v218_v46 = vld [vmem:[%s1416_s2 + $0xc0] sm:$0xff]  ;;  %s681_s28 = sshll.u32 %s1420_s13, 6  ;;  %s677_s4 = sshll.u32 %s1420_s13, 3 }
   0xf   : > { %861 = vmatpush3.bf16.msra.mxu1 %v860_v25  ;;  %831 = vmatprep.subr.bf16.mxu0 %v830_v26  ;;  %v201_v42 = vld [vmem:[%s1416_s2 + $0x38] sm:$0xff]  ;;  %v866_v43 = vpack.c.bf16 %v249_v40, %v248_v37  ;;  %v232_v44 = vld [vmem:[%s1416_s2 + $0x130] sm:$0xff]  ;;  %v219_v47 = vld [vmem:[%s1416_s2 + $0xc8] sm:$0xff]  ;;  %s1160_s10 = scalar_lea.vmem %s1414_s0, %s681_s28  ;;  %s181_s7 = scalar_lea.vmem %s1415_s1, %s677_s4 }
  0x10   : > { %863 = vmatprep.subr.bf16.mxu1 %v862_v30  ;;  %v233_v45 = vld [vmem:[%s1416_s2 + $0x138] sm:$0xff]  ;;  %v250_v48 = vld [vmem:[%s1416_s2 + $0x1c0] sm:$0xff]  ;;  %v251_v49 = vld [vmem:[%s1416_s2 + $0x1c8] sm:$0xff]  ;;  %v836_v50 = vpack.c.bf16 %v201_v42, %v200_v41  ;;  %v838_v52 = vpack.c.bf16 %v219_v47, %v218_v46  ;;  %s185_s9 = scalar_lea.vmem %s1417_s3, %s677_s4 }
  0x11   : > { %v868_v51 = vpack.c.bf16 %v233_v45, %v232_v44  ;;  %v202_v53 = vld [vmem:[%s1416_s2 + $0x40] sm:$0xff]  ;;  %v203_v54 = vld [vmem:[%s1416_s2 + $0x48] sm:$0xff]  ;;  %v870_v56 = vpack.c.bf16 %v251_v49, %v250_v48  ;;  %v220_v58 = vld [vmem:[%s1416_s2 + $0xd0] sm:$0xff] }
  0x12   : > { %833 = vmatpush3.bf16.msra.mxu0 %v832_v34  ;;  %v234_v55 = vld [vmem:[%s1416_s2 + $0x140] sm:$0xff]  ;;  %v235_v57 = vld [vmem:[%s1416_s2 + $0x148] sm:$0xff]  ;;  %v221_v59 = vld [vmem:[%s1416_s2 + $0xd8] sm:$0xff]  ;;  %v840_v62 = vpack.c.bf16 %v203_v54, %v202_v53 }
  0x13   : > { %865 = vmatpush3.bf16.msra.mxu1 %v864_v38  ;;  %835 = vmatprep.subr.bf16.mxu0 %v834_v39  ;;  %v252_v60 = vld [vmem:[%s1416_s2 + $0x1d0] sm:$0xff]  ;;  %v253_v61 = vld [vmem:[%s1416_s2 + $0x1d8] sm:$0xff]  ;;  %v872_v63 = vpack.c.bf16 %v235_v57, %v234_v55  ;;  %v842_v0 = vpack.c.bf16 %v221_v59, %v220_v58  ;;  %v222_v6 = vld [vmem:[%s1416_s2 + $0xe0] sm:$0xff] }
  0x14   : > { %867 = vmatprep.subr.bf16.mxu1 %v866_v43  ;;  %v204_v1 = vld [vmem:[%s1416_s2 + $0x50] sm:$0xff]  ;;  %v205_v2 = vld [vmem:[%s1416_s2 + $0x58] sm:$0xff]  ;;  %v874_v4 = vpack.c.bf16 %v253_v61, %v252_v60  ;;  %v223_v7 = vld [vmem:[%s1416_s2 + $0xe8] sm:$0xff] }
  0x15   : > { %v236_v3 = vld [vmem:[%s1416_s2 + $0x150] sm:$0xff]  ;;  %v237_v5 = vld [vmem:[%s1416_s2 + $0x158] sm:$0xff]  ;;  %v254_v8 = vld [vmem:[%s1416_s2 + $0x1e0] sm:$0xff]  ;;  %v844_v10 = vpack.c.bf16 %v205_v2, %v204_v1  ;;  %v846_v14 = vpack.c.bf16 %v223_v7, %v222_v6 }
  0x16   : > { %837 = vmatpush3.bf16.msra.mxu0 %v836_v50  ;;  %v255_v9 = vld [vmem:[%s1416_s2 + $0x1e8] sm:$0xff]  ;;  %v206_v11 = vld [vmem:[%s1416_s2 + $0x60] sm:$0xff]  ;;  %v876_v13 = vpack.c.bf16 %v237_v5, %v236_v3  ;;  %v189_v17 = vld [vmem:[%s1160_s10 + $0x18] sm:$0xff] }
  0x17   : > { %869 = vmatpush3.bf16.msra.mxu1 %v868_v51  ;;  %839 = vmatprep.subr.bf16.mxu0 %v838_v52  ;;  %v207_v12 = vld [vmem:[%s1416_s2 + $0x68] sm:$0xff]  ;;  %v238_v15 = vld [vmem:[%s1416_s2 + $0x160] sm:$0xff]  ;;  %v878_v18 = vpack.c.bf16 %v255_v9, %v254_v8  ;;  %v224_v20 = vld [vmem:[%s1416_s2 + $0xf0] sm:$0xff] }
  0x18   : > { %871 = vmatprep.subr.bf16.mxu1 %v870_v56  ;;  %v187_v16 = vld [vmem:[%s1160_s10 + $0x8] sm:$0xff]  ;;  %v225_v21 = vld [vmem:[%s1416_s2 + $0xf8] sm:$0xff]  ;;  %v256_v22 = vld [vmem:[%s1416_s2 + $0x1f0] sm:$0xff]  ;;  %456 = vmatprep.mubr.f32.mxu1 %v189_v17  ;;  %v848_v24 = vpack.c.bf16 %v207_v12, %v206_v11 }
  0x19   : > { %v239_v19 = vld [vmem:[%s1416_s2 + $0x168] sm:$0xff]  ;;  %386 = vmatprep.mubr.f32.mxu0 %v187_v16  ;;  %v257_v23 = vld [vmem:[%s1416_s2 + $0x1f8] sm:$0xff]  ;;  %v850_v26 = vpack.c.bf16 %v225_v21, %v224_v20  ;;  %v208_v27 = vld [vmem:[%s1416_s2 + $0x70] sm:$0xff] }
  0x1a   : > { %841 = vmatpush3.bf16.msra.mxu0 %v840_v62  ;;  %v880_v25 = vpack.c.bf16 %v239_v19, %v238_v15  ;;  %v209_v28 = vld [vmem:[%s1416_s2 + $0x78] sm:$0xff]  ;;  %v240_v29 = vld [vmem:[%s1416_s2 + $0x170] sm:$0xff]  ;;  %v882_v30 = vpack.c.bf16 %v257_v23, %v256_v22  ;;  %v274_v32 = vld [vmem:[%s1416_s2 + $0x280] sm:$0xff] }
  0x1b   : > { %873 = vmatpush3.bf16.msra.mxu1 %v872_v63  ;;  %843 = vmatprep.subr.bf16.mxu0 %v842_v0  ;;  %v241_v31 = vld [vmem:[%s1416_s2 + $0x178] sm:$0xff]  ;;  %v275_v33 = vld [vmem:[%s1416_s2 + $0x288] sm:$0xff]  ;;  %v306_v34 = vld [vmem:[%s1416_s2 + $0x380] sm:$0xff]  ;;  %v852_v36 = vpack.c.bf16 %v209_v28, %v208_v27 }
  0x1c   : > { %875 = vmatprep.subr.bf16.mxu1 %v874_v4  ;;  %v307_v35 = vld [vmem:[%s1416_s2 + $0x388] sm:$0xff]  ;;  %v884_v37 = vpack.c.bf16 %v241_v31, %v240_v29  ;;  %v886_v38 = vpack.c.bf16 %v275_v33, %v274_v32  ;;  %v258_v39 = vld [vmem:[%s1416_s2 + $0x200] sm:$0xff]  ;;  %v276_v44 = vld [vmem:[%s1416_s2 + $0x290] sm:$0xff] }
  0x1d   : > { %v259_v40 = vld [vmem:[%s1416_s2 + $0x208] sm:$0xff]  ;;  %v290_v41 = vld [vmem:[%s1416_s2 + $0x300] sm:$0xff]  ;;  %v918_v42 = vpack.c.bf16 %v307_v35, %v306_v34  ;;  %v277_v45 = vld [vmem:[%s1416_s2 + $0x298] sm:$0xff] }
  0x1e   : > { %845 = vmatpush3.bf16.msra.mxu0 %v844_v10  ;;  %v291_v43 = vld [vmem:[%s1416_s2 + $0x308] sm:$0xff]  ;;  %v308_v46 = vld [vmem:[%s1416_s2 + $0x390] sm:$0xff]  ;;  %v309_v47 = vld [vmem:[%s1416_s2 + $0x398] sm:$0xff]  ;;  %v888_v50 = vpack.c.bf16 %v259_v40, %v258_v39  ;;  %v890_v52 = vpack.c.bf16 %v277_v45, %v276_v44 }
  0x1f   : > { %877 = vmatpush3.bf16.msra.mxu1 %v876_v13  ;;  %847 = vmatprep.subr.bf16.mxu0 %v846_v14  ;;  %v186_v48 = vld [vmem:[%s1160_s10] sm:$0xff]  ;;  %v188_v49 = vld [vmem:[%s1160_s10 + $0x10] sm:$0xff]  ;;  %v920_v51 = vpack.c.bf16 %v291_v43, %v290_v41  ;;  %v261_v54 = vld [vmem:[%s1416_s2 + $0x218] sm:$0xff]  ;;  %v922_v56 = vpack.c.bf16 %v309_v47, %v308_v46 }
  0x20   : > { %879 = vmatprep.subr.bf16.mxu1 %v878_v18  ;;  %v260_v53 = vld [vmem:[%s1416_s2 + $0x210] sm:$0xff]  ;;  %v293_v57 = vld [vmem:[%s1416_s2 + $0x318] sm:$0xff]  ;;  %v278_v58 = vld [vmem:[%s1416_s2 + $0x2a0] sm:$0xff] }
  0x21   : > { %v292_v55 = vld [vmem:[%s1416_s2 + $0x310] sm:$0xff]  ;;  %v279_v59 = vld [vmem:[%s1416_s2 + $0x2a8] sm:$0xff]  ;;  %v310_v60 = vld [vmem:[%s1416_s2 + $0x3a0] sm:$0xff]  ;;  %v892_v62 = vpack.c.bf16 %v261_v54, %v260_v53 }
  0x22   : > { %849 = vmatpush3.bf16.msra.mxu0 %v848_v24  ;;  %v311_v61 = vld [vmem:[%s1416_s2 + $0x3a8] sm:$0xff]  ;;  %v924_v63 = vpack.c.bf16 %v293_v57, %v292_v55  ;;  %v894_v0 = vpack.c.bf16 %v279_v59, %v278_v58  ;;  %v262_v1 = vld [vmem:[%s1416_s2 + $0x220] sm:$0xff]  ;;  %v280_v6 = vld [vmem:[%s1416_s2 + $0x2b0] sm:$0xff] }
  0x23   : > { %881 = vmatpush3.bf16.msra.mxu1 %v880_v25  ;;  %851 = vmatprep.subr.bf16.mxu0 %v850_v26  ;;  %v263_v2 = vld [vmem:[%s1416_s2 + $0x228] sm:$0xff]  ;;  %v294_v3 = vld [vmem:[%s1416_s2 + $0x320] sm:$0xff]  ;;  %v926_v4 = vpack.c.bf16 %v311_v61, %v310_v60  ;;  %v281_v7 = vld [vmem:[%s1416_s2 + $0x2b8] sm:$0xff] }
  0x24   : > { %883 = vmatprep.subr.bf16.mxu1 %v882_v30  ;;  %v295_v5 = vld [vmem:[%s1416_s2 + $0x328] sm:$0xff]  ;;  %v312_v8 = vld [vmem:[%s1416_s2 + $0x3b0] sm:$0xff]  ;;  %v313_v9 = vld [vmem:[%s1416_s2 + $0x3b8] sm:$0xff]  ;;  %v896_v10 = vpack.c.bf16 %v263_v2, %v262_v1  ;;  %v898_v12 = vpack.c.bf16 %v281_v7, %v280_v6 }
  0x25   : > { %v928_v11 = vpack.c.bf16 %v295_v5, %v294_v3  ;;  %v264_v13 = vld [vmem:[%s1416_s2 + $0x230] sm:$0xff]  ;;  %v265_v14 = vld [vmem:[%s1416_s2 + $0x238] sm:$0xff]  ;;  %v930_v16 = vpack.c.bf16 %v313_v9, %v312_v8  ;;  %v282_v18 = vld [vmem:[%s1416_s2 + $0x2c0] sm:$0xff] }
  0x26   : > { %853 = vmatpush3.bf16.msra.mxu0 %v852_v36  ;;  %v296_v15 = vld [vmem:[%s1416_s2 + $0x330] sm:$0xff]  ;;  %v297_v17 = vld [vmem:[%s1416_s2 + $0x338] sm:$0xff]  ;;  %v283_v19 = vld [vmem:[%s1416_s2 + $0x2c8] sm:$0xff]  ;;  %v900_v22 = vpack.c.bf16 %v265_v14, %v264_v13 }
  0x27   : > { %885 = vmatpush3.bf16.msra.mxu1 %v884_v37  ;;  %887 = vmatprep.subr.bf16.mxu0 %v886_v38  ;;  %v314_v20 = vld [vmem:[%s1416_s2 + $0x3c0] sm:$0xff]  ;;  %v315_v21 = vld [vmem:[%s1416_s2 + $0x3c8] sm:$0xff]  ;;  %v193_v24 = vld [vmem:[%s1160_s10 + $0x38] sm:$0xff]  ;;  %v932_v25 = vpack.c.bf16 %v297_v17, %v296_v15  ;;  %v902_v26 = vpack.c.bf16 %v283_v19, %v282_v18 }
  0x28   : > { %919 = vmatprep.subr.bf16.mxu1 %v918_v42  ;;  %v191_v23 = vld [vmem:[%s1160_s10 + $0x28] sm:$0xff]  ;;  %v266_v27 = vld [vmem:[%s1416_s2 + $0x240] sm:$0xff]  ;;  %v934_v30 = vpack.c.bf16 %v315_v21, %v314_v20  ;;  %v284_v32 = vld [vmem:[%s1416_s2 + $0x2d0] sm:$0xff] }
  0x29   : > { %387 = vmatmul.mubr.f32.vlgmr.msra.gmra.mrb[0].mxu0 %v186_v48  ;;  %v267_v28 = vld [vmem:[%s1416_s2 + $0x248] sm:$0xff]  ;;  %v298_v29 = vld [vmem:[%s1416_s2 + $0x340] sm:$0xff]  ;;  %v285_v33 = vld [vmem:[%s1416_s2 + $0x2d8] sm:$0xff] }
  0x2a   : > { %457 = vmatmul.mubr.f32.vlgmr.msra.gmra.mrb[0].mxu1 %v188_v49  ;;  %889 = vmatpush3.bf16.msra.mxu0 %v888_v50  ;;  %v299_v31 = vld [vmem:[%s1416_s2 + $0x348] sm:$0xff]  ;;  %v316_v34 = vld [vmem:[%s1416_s2 + $0x3d0] sm:$0xff]  ;;  %v317_v35 = vld [vmem:[%s1416_s2 + $0x3d8] sm:$0xff]  ;;  %v904_v36 = vpack.c.bf16 %v267_v28, %v266_v27  ;;  %v906_v38 = vpack.c.bf16 %v285_v33, %v284_v32 }
  0x2b   : > { %921 = vmatpush3.bf16.msra.mxu1 %v920_v51  ;;  %891 = vmatprep.subr.bf16.mxu0 %v890_v52  ;;  %v936_v37 = vpack.c.bf16 %v299_v31, %v298_v29  ;;  %v268_v39 = vld [vmem:[%s1416_s2 + $0x250] sm:$0xff]  ;;  %v269_v40 = vld [vmem:[%s1416_s2 + $0x258] sm:$0xff]  ;;  %v938_v42 = vpack.c.bf16 %v317_v35, %v316_v34  ;;  %v286_v44 = vld [vmem:[%s1416_s2 + $0x2e0] sm:$0xff] }
  0x2c   : > { %923 = vmatprep.subr.bf16.mxu1 %v922_v56  ;;  %526 = vmatprep.mubr.f32.mxu0 %v191_v23  ;;  %v300_v41 = vld [vmem:[%s1416_s2 + $0x350] sm:$0xff]  ;;  %v301_v43 = vld [vmem:[%s1416_s2 + $0x358] sm:$0xff]  ;;  %v287_v45 = vld [vmem:[%s1416_s2 + $0x2e8] sm:$0xff]  ;;  %v908_v48 = vpack.c.bf16 %v269_v40, %v268_v39 }
  0x2d   : > { %596 = vmatprep.mubr.f32.mxu1 %v193_v24  ;;  %v318_v46 = vld [vmem:[%s1416_s2 + $0x3e0] sm:$0xff]  ;;  %v319_v47 = vld [vmem:[%s1416_s2 + $0x3e8] sm:$0xff]  ;;  %v940_v49 = vpack.c.bf16 %v301_v43, %v300_v41  ;;  %v910_v50 = vpack.c.bf16 %v287_v45, %v286_v44  ;;  %v288_v56 = vld [vmem:[%s1416_s2 + $0x2f0] sm:$0xff] }
  0x2e   : > { %893 = vmatpush3.bf16.msra.mxu0 %v892_v62  ;;  %v270_v51 = vld [vmem:[%s1416_s2 + $0x260] sm:$0xff]  ;;  %v271_v52 = vld [vmem:[%s1416_s2 + $0x268] sm:$0xff]  ;;  %v942_v54 = vpack.c.bf16 %v319_v47, %v318_v46  ;;  %v289_v57 = vld [vmem:[%s1416_s2 + $0x2f8] sm:$0xff] }
  0x2f   : > { %925 = vmatpush3.bf16.msra.mxu1 %v924_v63  ;;  %895 = vmatprep.subr.bf16.mxu0 %v894_v0  ;;  %v302_v53 = vld [vmem:[%s1416_s2 + $0x360] sm:$0xff]  ;;  %v303_v55 = vld [vmem:[%s1416_s2 + $0x368] sm:$0xff]  ;;  %v320_v58 = vld [vmem:[%s1416_s2 + $0x3f0] sm:$0xff]  ;;  %v912_v60 = vpack.c.bf16 %v271_v52, %v270_v51  ;;  %v914_v62 = vpack.c.bf16 %v289_v57, %v288_v56 }
  0x30   : > { %927 = vmatprep.subr.bf16.mxu1 %v926_v4  ;;  %v321_v59 = vld [vmem:[%s1416_s2 + $0x3f8] sm:$0xff]  ;;  %v944_v61 = vpack.c.bf16 %v303_v55, %v302_v53  ;;  %v272_v63 = vld [vmem:[%s1416_s2 + $0x270] sm:$0xff]  ;;  %v190_v6 = vld [vmem:[%s1160_s10 + $0x20] sm:$0xff] }
  0x31   : > { %v273_v0 = vld [vmem:[%s1416_s2 + $0x278] sm:$0xff]  ;;  %v946_v1 = vpack.c.bf16 %v321_v59, %v320_v58  ;;  %v304_v2 = vld [vmem:[%s1416_s2 + $0x370] sm:$0xff] }
  0x32   : > { %897 = vmatpush3.bf16.msra.mxu0 %v896_v10  ;;  %v305_v3 = vld [vmem:[%s1416_s2 + $0x378] sm:$0xff]  ;;  %v916_v4 = vpack.c.bf16 %v273_v0, %v272_v63  ;;  %v192_v7 = vld [vmem:[%s1160_s10 + $0x30] sm:$0xff] }
  0x33   : > { %929 = vmatpush3.bf16.msra.mxu1 %v928_v11  ;;  %899 = vmatprep.subr.bf16.mxu0 %v898_v12  ;;  %v948_v5 = vpack.c.bf16 %v305_v3, %v304_v2 }
  0x34   : > { %931 = vmatprep.subr.bf16.mxu1 %v930_v16 }
  0x36   : > { %901 = vmatpush3.bf16.msra.mxu0 %v900_v22  ;;  %v602_v22 = vld [vmem:[%s181_s7] sm:$0xff] }
  0x37   : > { %933 = vmatpush3.bf16.msra.mxu1 %v932_v25  ;;  %903 = vmatprep.subr.bf16.mxu0 %v902_v26 }
  0x38   : > { %935 = vmatprep.subr.bf16.mxu1 %v934_v30 }
  0x3a   : > { %905 = vmatpush3.bf16.msra.mxu0 %v904_v36 }
  0x3b   : > { %937 = vmatpush3.bf16.msra.mxu1 %v936_v37  ;;  %907 = vmatprep.subr.bf16.mxu0 %v906_v38 }
  0x3c   : > { %939 = vmatprep.subr.bf16.mxu1 %v938_v42 }
  0x3e   : > { %909 = vmatpush3.bf16.msra.mxu0 %v908_v48 }
  0x3f   : > { %941 = vmatpush3.bf16.msra.mxu1 %v940_v49  ;;  %911 = vmatprep.subr.bf16.mxu0 %v910_v50 }
  0x40   : > { %943 = vmatprep.subr.bf16.mxu1 %v942_v54 }
  0x42   : > { %913 = vmatpush3.bf16.msra.mxu0 %v912_v60 }
  0x43   : > { %945 = vmatpush3.bf16.msra.mxu1 %v944_v61  ;;  %915 = vmatprep.subr.bf16.mxu0 %v914_v62 }
  0x44   : > { %947 = vmatprep.subr.bf16.mxu1 %v946_v1 }
  0x46   : > { %917 = vmatpush3.bf16.msra.mxu0 %v916_v4 }
  0x47   : > { %949 = vmatpush3.bf16.msra.mxu1 %v948_v5 }
  0x49   : > { %527 = vmatmul.mubr.f32.vlgmr.msra.gmra.mrb[2].mxu0 %v190_v6 }
  0x4a   : > { %597 = vmatmul.mubr.f32.vlgmr.msra.gmra.mrb[2].mxu1 %v192_v7 }
  0xfc   : > { %v714_v8 = vpop.f32.mrb[0].mxu0 }
  0xfd   : > { %v749_v9 = vpop.f32.mrb[0].mxu1  ;;  %v715_v10 = vpop.f32.mrb[1].mxu0 }
  0xfe   : > { %v716_v11 = vadd.f32 %v715_v10, %v714_v8  ;;  %v750_v12 = vpop.f32.mrb[1].mxu1 }
  0xff   : > { %v751_v13 = vadd.f32 %v750_v12, %v749_v9 }
 0x101   : > { %v459_v14 = vadd.f32 %v751_v13, %v716_v11 }
 0x11c   : > { %v784_v15 = vpop.f32.mrb[2].mxu0 }
 0x11d   : > { %v785_v16 = vpop.f32.mrb[3].mxu0  ;;  %v819_v17 = vpop.f32.mrb[2].mxu1 }
 0x11e   : > { %v786_v18 = vadd.f32 %v785_v16, %v784_v15  ;;  %v820_v19 = vpop.f32.mrb[3].mxu1 }
 0x11f   : > { %v821_v20 = vadd.f32 %v820_v19, %v819_v17 }
 0x120   : > { %v529_v21 = vadd.f32 %v786_v18, %v459_v14 }
 0x122   : > { %v599_v23 = vadd.f32 %v821_v20, %v529_v21 }
 0x124   : > { %v603_v24 = vmul.f32 %v602_v22, %v599_v23 }
 0x126   : > { %604 = vst [vmem:[%s185_s9] sm:$0xff] %v603_v24 }
 0x127 PF: > { %s13_s12 = sadd.s32 1, %s964_s12  }
 0x128   : > { %p10_p4 = scmp.ge.s32.totalorder %s13_s12, 4  }
 0x12a   :  { %12 = sbr.rel (!%p10_p4) target bundleno = 1 (0x1), region = 65 }

</bundles_post_ra>
